<compile_context>
chip_gen: v7x
topology: tpu7x:2x2x1
jax: 0.10.0
libtpu: 0.0.40
codegen_flags: <defaults>
</compile_context>

<pallas_src>
import functools

import jax
import jax.numpy as jnp
from jax.experimental import pallas as pl
from jax.experimental.pallas import tpu as pltpu


# ----------------------------------------------------------------------------
# Kernel A: input projection for both directions (one big row-tiled GEMM).
#   gx_f = x2d @ Wi_f + bi_f ,  gx_b = x2d @ Wi_b + bi_b
# ----------------------------------------------------------------------------
def _in_proj_kernel(x_ref, wif_ref, wib_ref, bif_ref, bib_ref, gf_ref, gb_ref):
    x = x_ref[...]
    gf_ref[...] = (jnp.dot(x, wif_ref[...], preferred_element_type=jnp.float32)
                   + bif_ref[...])
    gb_ref[...] = (jnp.dot(x, wib_ref[...], preferred_element_type=jnp.float32)
                   + bib_ref[...])


# ----------------------------------------------------------------------------
# Kernel B: bidirectional GRU recurrence over a chunk of timesteps.
# grid = (N // T_CHUNK,), sequential ("arbitrary"). Hidden states live in VMEM
# scratch and persist across grid iterations. gx already contains x@Wi + bi;
# the hidden projection is one fused (B,H)@(H,3H) dot per direction per step.
# PyTorch gate order along the 3H axis: [r | z | n], with
#   n = tanh(gx_n + r * (h @ Wh_n + bh_n))
# ----------------------------------------------------------------------------
def _gru_bidir_kernel(gxf_ref, gxb_ref,
                      whf_ref, bhf_ref, whb_ref, bhb_ref,
                      of_ref, ob_ref,
                      hf_scr, hb_scr, *, hidden_dim):
    H = hidden_dim
    c = pl.program_id(0)

    @pl.when(c == 0)
    def _():
        hf_scr[...] = jnp.zeros_like(hf_scr)
        hb_scr[...] = jnp.zeros_like(hb_scr)

    T = gxf_ref.shape[0]

    def gru_step(gx, h, wh_ref, bh_ref):
        gh = jnp.dot(h, wh_ref[...], preferred_element_type=jnp.float32) + bh_ref[...]
        r = jax.nn.sigmoid(gx[:, :H] + gh[:, :H])
        z = jax.nn.sigmoid(gx[:, H:2 * H] + gh[:, H:2 * H])
        n = jnp.tanh(gx[:, 2 * H:] + r * gh[:, 2 * H:])
        return (1.0 - z) * n + z * h

    @pl.loop(0, T)
    def _(s):
        # forward direction: timestep s within this chunk
        hf_new = gru_step(gxf_ref[s], hf_scr[...], whf_ref, bhf_ref)
        hf_scr[...] = hf_new
        of_ref[s] = hf_new

        # backward direction: walk this (reverse-indexed) chunk back-to-front
        sb = T - 1 - s
        hb_new = gru_step(gxb_ref[sb], hb_scr[...], whb_ref, bhb_ref)
        hb_scr[...] = hb_new
        ob_ref[sb] = hb_new


# ----------------------------------------------------------------------------
# Kernel C: fused ReLU + Linear head on 2D row tiles, lane-dense padded output.
#   y = relu(hf) @ Wf_pad + relu(hb) @ Wb_pad + b_pad     (last dim padded to 128)
# ----------------------------------------------------------------------------
def _relu_fc_kernel(hf_ref, hb_ref, wf_ref, wb_ref, b_ref, out_ref):
    hf = jnp.maximum(hf_ref[...], 0.0)
    hb = jnp.maximum(hb_ref[...], 0.0)
    y = jnp.dot(hf, wf_ref[...], preferred_element_type=jnp.float32)
    y = y + jnp.dot(hb, wb_ref[...], preferred_element_type=jnp.float32)
    out_ref[...] = y + b_ref[...]


def _pick_time_chunk(n_steps, batch, width, budget_bytes=2 << 20, max_chunk=128):
    """Largest divisor of n_steps whose (chunk, B, 3H) f32 slab fits the budget."""
    best = 1
    for d in range(1, n_steps + 1):
        if n_steps % d != 0 or d > max_chunk:
            continue
        if d * batch * width * 4 <= budget_bytes:
            best = d
    return best


def gru_head_forward(x, params):
    """x: (B, N, C) float32 (batch_first, like the PyTorch module)."""
    B, N, C = x.shape
    H = params["wh_f"].shape[0]
    three_h = 3 * H
    n_class = params["fc_wf"].shape[1]
    NB = N * B

    # ---- time-major, flattened rows for the GEMM kernels (free reshapes) ----
    xt = jnp.transpose(x, (1, 0, 2))          # (N, B, C)
    x2d = xt.reshape(NB, C)                   # (N*B, C)

    row_tile = NB if NB <= 512 else 512       # row tile for both GEMM kernels
    n_row_blocks = pl.cdiv(NB, row_tile)

    # ---- Kernel A: input projections for both directions ----
    gxf2d, gxb2d = pl.pallas_call(
        _in_proj_kernel,
        out_shape=(jax.ShapeDtypeStruct((NB, three_h), jnp.float32),
                   jax.ShapeDtypeStruct((NB, three_h), jnp.float32)),
        grid_spec=pltpu.PrefetchScalarGridSpec(
            num_scalar_prefetch=0,
            grid=(n_row_blocks,),
            in_specs=[
                pl.BlockSpec((row_tile, C), lambda i: (i, 0)),
                pl.BlockSpec((C, three_h), lambda i: (0, 0)),
                pl.BlockSpec((C, three_h), lambda i: (0, 0)),
                pl.BlockSpec((1, three_h), lambda i: (0, 0)),
                pl.BlockSpec((1, three_h), lambda i: (0, 0)),
            ],
            out_specs=[
                pl.BlockSpec((row_tile, three_h), lambda i: (i, 0)),
                pl.BlockSpec((row_tile, three_h), lambda i: (i, 0)),
            ],
        ),
        compiler_params=pltpu.CompilerParams(dimension_semantics=("parallel",)),
    )(x2d, params["wi_f"], params["wi_b"], params["bi_f"], params["bi_b"])

    gx_f = gxf2d.reshape(N, B, three_h)       # free reshape
    gx_b = gxb2d.reshape(N, B, three_h)

    # ---- Kernel B: the recurrence, chunked over time ----
    t_chunk = _pick_time_chunk(N, B, three_h)
    n_chunks = N // t_chunk

    out_f, out_b = pl.pallas_call(
        functools.partial(_gru_bidir_kernel, hidden_dim=H),
        out_shape=(jax.ShapeDtypeStruct((N, B, H), jnp.float32),
                   jax.ShapeDtypeStruct((N, B, H), jnp.float32)),
        grid_spec=pltpu.PrefetchScalarGridSpec(
            num_scalar_prefetch=0,
            grid=(n_chunks,),
            in_specs=[
                pl.BlockSpec((t_chunk, B, three_h), lambda i: (i, 0, 0)),
                pl.BlockSpec((t_chunk, B, three_h),
                             lambda i: (n_chunks - 1 - i, 0, 0)),
                pl.BlockSpec((H, three_h), lambda i: (0, 0)),
                pl.BlockSpec((1, three_h), lambda i: (0, 0)),
                pl.BlockSpec((H, three_h), lambda i: (0, 0)),
                pl.BlockSpec((1, three_h), lambda i: (0, 0)),
            ],
            out_specs=[
                pl.BlockSpec((t_chunk, B, H), lambda i: (i, 0, 0)),
                pl.BlockSpec((t_chunk, B, H),
                             lambda i: (n_chunks - 1 - i, 0, 0)),
            ],
            scratch_shapes=[pltpu.VMEM((B, H), jnp.float32),
                            pltpu.VMEM((B, H), jnp.float32)],
        ),
        compiler_params=pltpu.CompilerParams(dimension_semantics=("arbitrary",)),
    )(gx_f, gx_b,
      params["wh_f"], params["bh_f"], params["wh_b"], params["bh_b"])

    # ---- Kernel C: ReLU + Linear, lane-dense padded output, row-tiled ----
    P = ((n_class + 127) // 128) * 128        # pad n_class up to 128 lanes
    wf_pad = jnp.zeros((H, P), jnp.float32).at[:, :n_class].set(params["fc_wf"])
    wb_pad = jnp.zeros((H, P), jnp.float32).at[:, :n_class].set(params["fc_wb"])
    b_pad = jnp.zeros((1, P), jnp.float32).at[:, :n_class].set(
        params["fc_b"].reshape(1, n_class))

    hf2d = out_f.reshape(NB, H)               # free reshape (row-major)
    hb2d = out_b.reshape(NB, H)

    y_pad = pl.pallas_call(
        _relu_fc_kernel,
        out_shape=jax.ShapeDtypeStruct((NB, P), jnp.float32),
        grid_spec=pltpu.PrefetchScalarGridSpec(
            num_scalar_prefetch=0,
            grid=(n_row_blocks,),
            in_specs=[
                pl.BlockSpec((row_tile, H), lambda i: (i, 0)),
                pl.BlockSpec((row_tile, H), lambda i: (i, 0)),
                pl.BlockSpec((H, P), lambda i: (0, 0)),
                pl.BlockSpec((H, P), lambda i: (0, 0)),
                pl.BlockSpec((1, P), lambda i: (0, 0)),
            ],
            out_specs=pl.BlockSpec((row_tile, P), lambda i: (i, 0)),
        ),
        compiler_params=pltpu.CompilerParams(dimension_semantics=("parallel",)),
    )(hf2d, hb2d, wf_pad, wb_pad, b_pad)

    y = y_pad.reshape(N, B, P)[:, :, :n_class]
    return jnp.transpose(y, (1, 0, 2))        # (B, N, n_class)

    # TODO(synk): v7x-only variant could split the two directions across the 2
    # TensorCores (direction as a leading "parallel" grid axis).


# ----------------------------------------------------------------------------
# Pure-JAX reference (same math, lax.scan recurrence) for validation.
# ----------------------------------------------------------------------------
def gru_head_reference(x, p):
    B, N, C = x.shape
    H = p["wh_f"].shape[0]
    xt = jnp.transpose(x, (1, 0, 2))          # (N, B, C)

    def cell(gx, h, wh, bh):
        gh = h @ wh + bh
        r = jax.nn.sigmoid(gx[:, :H] + gh[:, :H])
        z = jax.nn.sigmoid(gx[:, H:2 * H] + gh[:, H:2 * H])
        n = jnp.tanh(gx[:, 2 * H:] + r * gh[:, 2 * H:])
        return (1.0 - z) * n + z * h

    def scan_dir(wi, wh, bi, bh, xs):
        gx = xs @ wi + bi                     # (N, B, 3H)
        def f(h, gx_t):
            h_new = cell(gx_t, h, wh, bh)
            return h_new, h_new
        _, ys = jax.lax.scan(f, jnp.zeros((B, H), jnp.float32), gx)
        return ys

    of = scan_dir(p["wi_f"], p["wh_f"], p["bi_f"], p["bh_f"], xt)
    ob = scan_dir(p["wi_b"], p["wh_b"], p["bi_b"], p["bh_b"], xt[::-1])[::-1]
    f0 = jax.nn.relu(jnp.concatenate([of, ob], axis=-1))        # (N, B, 2H)
    fc_w = jnp.concatenate([p["fc_wf"], p["fc_wb"]], axis=0)    # (2H, n_class)
    out = f0 @ fc_w + p["fc_b"]                                 # (N, B, n_class)
    return jnp.transpose(out, (1, 0, 2))


def init_params(key, input_dim, hidden_dim, n_class):
    """Deterministic synthetic parameters (PyTorch-style uniform init).

    Gate-fused layout: wi is (C, 3H), wh is (H, 3H), biases (1, 3H), with the
    3H axis ordered [r | z | n] like PyTorch's nn.GRU weight_ih/hh stacking.
    The fc weight (n_class, 2H) is stored as its forward/backward halves,
    transposed to (H, n_class) each.
    """
    keys = jax.random.split(key, 11)
    k_gru = 1.0 / jnp.sqrt(hidden_dim)
    k_fc = 1.0 / jnp.sqrt(2 * hidden_dim)
    u = lambda kk, shape, lim: jax.random.uniform(kk, shape, jnp.float32, -lim, lim)
    return {
        "wi_f": u(keys[0], (input_dim, 3 * hidden_dim), k_gru),
        "wh_f": u(keys[1], (hidden_dim, 3 * hidden_dim), k_gru),
        "bi_f": u(keys[2], (1, 3 * hidden_dim), k_gru),
        "bh_f": u(keys[3], (1, 3 * hidden_dim), k_gru),
        "wi_b": u(keys[4], (input_dim, 3 * hidden_dim), k_gru),
        "wh_b": u(keys[5], (hidden_dim, 3 * hidden_dim), k_gru),
        "bi_b": u(keys[6], (1, 3 * hidden_dim), k_gru),
        "bh_b": u(keys[7], (1, 3 * hidden_dim), k_gru),
        "fc_wf": u(keys[8], (hidden_dim, n_class), k_fc),
        "fc_wb": u(keys[9], (hidden_dim, n_class), k_fc),
        "fc_b": u(keys[10], (n_class,), k_fc),
    }


if __name__ == "__main__":
    B, N, C = 2, 8, 16        # batch, sequence length, input_dim
    H, n_class = 32, 8        # hidden_dim, n_class

    key = jax.random.PRNGKey(0)
    k_x, k_p = jax.random.split(key)
    x = jax.random.normal(k_x, (B, N, C), dtype=jnp.float32)
    params = init_params(k_p, C, H, n_class)

    out = jax.jit(gru_head_forward)(x, params)
    out = jax.block_until_ready(out)

    ref = gru_head_reference(x, params)
    assert out.shape == (B, N, n_class)
    assert jnp.allclose(out, ref, atol=1e-5, rtol=1e-5), (
        f"max abs err = {jnp.max(jnp.abs(out - ref))}")

    print("KERNEL_OK")
</pallas_src>

<mosaic_0001>
module attributes {stable_mosaic.version = 11 : i64} {
  func.func @_in_proj_kernel(%arg0: i32, %arg1: memref<16x16xf32, #tpu.memory_space<vmem>>, %arg2: memref<16x96xf32, #tpu.memory_space<vmem>>, %arg3: memref<16x96xf32, #tpu.memory_space<vmem>>, %arg4: memref<1x96xf32, #tpu.memory_space<vmem>>, %arg5: memref<1x96xf32, #tpu.memory_space<vmem>>, %arg6: memref<16x96xf32, #tpu.memory_space<vmem>>, %arg7: memref<16x96xf32, #tpu.memory_space<vmem>>) attributes {dimension_semantics = [#tpu.dimension_semantics<parallel>], iteration_bounds = array<i64: 1>, scalar_prefetch = 0 : i64, scratch_operands = 0 : i64, tpu.core_type = #tpu.core_type<tc>, window_params = [{transform_indices = @transform_0, window_bounds = array<i64: 16, 16>}, {pipeline_mode = #tpu.pipeline_mode<synchronous>, transform_indices = @transform_1, window_bounds = array<i64: 16, 96>}, {pipeline_mode = #tpu.pipeline_mode<synchronous>, transform_indices = @transform_2, window_bounds = array<i64: 16, 96>}, {pipeline_mode = #tpu.pipeline_mode<synchronous>, transform_indices = @transform_3, window_bounds = array<i64: 1, 96>}, {pipeline_mode = #tpu.pipeline_mode<synchronous>, transform_indices = @transform_4, window_bounds = array<i64: 1, 96>}, {transform_indices = @transform_5, window_bounds = array<i64: 16, 96>}, {transform_indices = @transform_6, window_bounds = array<i64: 16, 96>}]} {
    %c0 = arith.constant 0 : index
    %c0_0 = arith.constant 0 : index
    %0 = vector.load %arg1[%c0, %c0_0] : memref<16x16xf32, #tpu.memory_space<vmem>>, vector<16x16xf32>
    %c0_1 = arith.constant 0 : index
    %c0_2 = arith.constant 0 : index
    %1 = vector.load %arg2[%c0_1, %c0_2] : memref<16x96xf32, #tpu.memory_space<vmem>>, vector<16x96xf32>
    %cst = arith.constant dense<0.000000e+00> : vector<16x96xf32>
    %2 = tpu.matmul %0, %1, %cst {dimension_numbers = #tpu.dot_dimension_numbers<[1], [0], [0], [1], [0, 0, 1, 1], [], []>} : vector<16x16xf32>, vector<16x96xf32>, vector<16x96xf32> -> vector<16x96xf32>
    %c0_3 = arith.constant 0 : index
    %c0_4 = arith.constant 0 : index
    %3 = vector.load %arg4[%c0_3, %c0_4] : memref<1x96xf32, #tpu.memory_space<vmem>>, vector<1x96xf32>
    %4 = vector.broadcast %3 : vector<1x96xf32> to vector<16x96xf32>
    %5 = arith.addf %2, %4 : vector<16x96xf32>
    %c0_5 = arith.constant 0 : index
    %c0_6 = arith.constant 0 : index
    %6 = vector.load %arg6[%c0_5, %c0_6] : memref<16x96xf32, #tpu.memory_space<vmem>>, vector<16x96xf32>
    tpu.vector_store %arg6[%c0_5, %c0_6], %5 {strides = array<i32>} : memref<16x96xf32, #tpu.memory_space<vmem>>, vector<16x96xf32>,
    %c0_7 = arith.constant 0 : index
    %c0_8 = arith.constant 0 : index
    %7 = vector.load %arg3[%c0_7, %c0_8] : memref<16x96xf32, #tpu.memory_space<vmem>>, vector<16x96xf32>
    %cst_9 = arith.constant dense<0.000000e+00> : vector<16x96xf32>
    %8 = tpu.matmul %0, %7, %cst_9 {dimension_numbers = #tpu.dot_dimension_numbers<[1], [0], [0], [1], [0, 0, 1, 1], [], []>} : vector<16x16xf32>, vector<16x96xf32>, vector<16x96xf32> -> vector<16x96xf32>
    %c0_10 = arith.constant 0 : index
    %c0_11 = arith.constant 0 : index
    %9 = vector.load %arg5[%c0_10, %c0_11] : memref<1x96xf32, #tpu.memory_space<vmem>>, vector<1x96xf32>
    %10 = vector.broadcast %9 : vector<1x96xf32> to vector<16x96xf32>
    %11 = arith.addf %8, %10 : vector<16x96xf32>
    %c0_12 = arith.constant 0 : index
    %c0_13 = arith.constant 0 : index
    %12 = vector.load %arg7[%c0_12, %c0_13] : memref<16x96xf32, #tpu.memory_space<vmem>>, vector<16x96xf32>
    tpu.vector_store %arg7[%c0_12, %c0_13], %11 {strides = array<i32>} : memref<16x96xf32, #tpu.memory_space<vmem>>, vector<16x96xf32>,
    return
  }
  func.func @transform_0(%arg0: i32) -> (i32, i32) {
    %c0_i32 = arith.constant 0 : i32
    %c0_i32_0 = arith.constant 0 : i32
    return %arg0, %c0_i32 : i32, i32
  }
  func.func @transform_1(%arg0: i32) -> (i32, i32) {
    %c0_i32 = arith.constant 0 : i32
    %c0_i32_0 = arith.constant 0 : i32
    %c0_i32_1 = arith.constant 0 : i32
    return %c0_i32, %c0_i32_0 : i32, i32
  }
  func.func @transform_2(%arg0: i32) -> (i32, i32) {
    %c0_i32 = arith.constant 0 : i32
    %c0_i32_0 = arith.constant 0 : i32
    %c0_i32_1 = arith.constant 0 : i32
    return %c0_i32, %c0_i32_0 : i32, i32
  }
  func.func @transform_3(%arg0: i32) -> (i32, i32) {
    %c0_i32 = arith.constant 0 : i32
    %c0_i32_0 = arith.constant 0 : i32
    %c0_i32_1 = arith.constant 0 : i32
    return %c0_i32, %c0_i32_0 : i32, i32
  }
  func.func @transform_4(%arg0: i32) -> (i32, i32) {
    %c0_i32 = arith.constant 0 : i32
    %c0_i32_0 = arith.constant 0 : i32
    %c0_i32_1 = arith.constant 0 : i32
    return %c0_i32, %c0_i32_0 : i32, i32
  }
  func.func @transform_5(%arg0: i32) -> (i32, i32) {
    %c0_i32 = arith.constant 0 : i32
    %c0_i32_0 = arith.constant 0 : i32
    return %arg0, %c0_i32 : i32, i32
  }
  func.func @transform_6(%arg0: i32) -> (i32, i32) {
    %c0_i32 = arith.constant 0 : i32
    %c0_i32_0 = arith.constant 0 : i32
    return %arg0, %c0_i32 : i32, i32
  }
}

module attributes {stable_mosaic.version = 11 : i64} {
  func.func @_relu_fc_kernel(%arg0: i32, %arg1: memref<16x32xf32, #tpu.memory_space<vmem>>, %arg2: memref<16x32xf32, #tpu.memory_space<vmem>>, %arg3: memref<32x128xf32, #tpu.memory_space<vmem>>, %arg4: memref<32x128xf32, #tpu.memory_space<vmem>>, %arg5: memref<1x128xf32, #tpu.memory_space<vmem>>, %arg6: memref<16x128xf32, #tpu.memory_space<vmem>>) attributes {dimension_semantics = [#tpu.dimension_semantics<parallel>], iteration_bounds = array<i64: 1>, scalar_prefetch = 0 : i64, scratch_operands = 0 : i64, tpu.core_type = #tpu.core_type<tc>, window_params = [{transform_indices = @transform_0, window_bounds = array<i64: 16, 32>}, {transform_indices = @transform_1, window_bounds = array<i64: 16, 32>}, {pipeline_mode = #tpu.pipeline_mode<synchronous>, transform_indices = @transform_2, window_bounds = array<i64: 32, 128>}, {pipeline_mode = #tpu.pipeline_mode<synchronous>, transform_indices = @transform_3, window_bounds = array<i64: 32, 128>}, {pipeline_mode = #tpu.pipeline_mode<synchronous>, transform_indices = @transform_4, window_bounds = array<i64: 1, 128>}, {transform_indices = @transform_5, window_bounds = array<i64: 16, 128>}]} {
    %c0 = arith.constant 0 : index
    %c0_0 = arith.constant 0 : index
    %0 = vector.load %arg1[%c0, %c0_0] : memref<16x32xf32, #tpu.memory_space<vmem>>, vector<16x32xf32>
    %cst = arith.constant 0.000000e+00 : f32
    %1 = vector.broadcast %cst : f32 to vector<16x32xf32>
    %2 = arith.maximumf %0, %1 : vector<16x32xf32>
    %c0_1 = arith.constant 0 : index
    %c0_2 = arith.constant 0 : index
    %3 = vector.load %arg2[%c0_1, %c0_2] : memref<16x32xf32, #tpu.memory_space<vmem>>, vector<16x32xf32>
    %cst_3 = arith.constant 0.000000e+00 : f32
    %4 = vector.broadcast %cst_3 : f32 to vector<16x32xf32>
    %5 = arith.maximumf %3, %4 : vector<16x32xf32>
    %c0_4 = arith.constant 0 : index
    %c0_5 = arith.constant 0 : index
    %6 = vector.load %arg3[%c0_4, %c0_5] : memref<32x128xf32, #tpu.memory_space<vmem>>, vector<32x128xf32>
    %cst_6 = arith.constant dense<0.000000e+00> : vector<16x128xf32>
    %7 = tpu.matmul %2, %6, %cst_6 {dimension_numbers = #tpu.dot_dimension_numbers<[1], [0], [0], [1], [0, 0, 1, 1], [], []>} : vector<16x32xf32>, vector<32x128xf32>, vector<16x128xf32> -> vector<16x128xf32>
    %c0_7 = arith.constant 0 : index
    %c0_8 = arith.constant 0 : index
    %8 = vector.load %arg4[%c0_7, %c0_8] : memref<32x128xf32, #tpu.memory_space<vmem>>, vector<32x128xf32>
    %cst_9 = arith.constant dense<0.000000e+00> : vector<16x128xf32>
    %9 = tpu.matmul %5, %8, %cst_9 {dimension_numbers = #tpu.dot_dimension_numbers<[1], [0], [0], [1], [0, 0, 1, 1], [], []>} : vector<16x32xf32>, vector<32x128xf32>, vector<16x128xf32> -> vector<16x128xf32>
    %10 = arith.addf %7, %9 : vector<16x128xf32>
    %c0_10 = arith.constant 0 : index
    %c0_11 = arith.constant 0 : index
    %11 = vector.load %arg5[%c0_10, %c0_11] : memref<1x128xf32, #tpu.memory_space<vmem>>, vector<1x128xf32>
    %12 = vector.broadcast %11 : vector<1x128xf32> to vector<16x128xf32>
    %13 = arith.addf %10, %12 : vector<16x128xf32>
    %c0_12 = arith.constant 0 : index
    %c0_13 = arith.constant 0 : index
    %14 = vector.load %arg6[%c0_12, %c0_13] : memref<16x128xf32, #tpu.memory_space<vmem>>, vector<16x128xf32>
    tpu.vector_store %arg6[%c0_12, %c0_13], %13 {strides = array<i32>} : memref<16x128xf32, #tpu.memory_space<vmem>>, vector<16x128xf32>,
    return
  }
  func.func @transform_0(%arg0: i32) -> (i32, i32) {
    %c0_i32 = arith.constant 0 : i32
    %c0_i32_0 = arith.constant 0 : i32
    return %arg0, %c0_i32 : i32, i32
  }
  func.func @transform_1(%arg0: i32) -> (i32, i32) {
    %c0_i32 = arith.constant 0 : i32
    %c0_i32_0 = arith.constant 0 : i32
    return %arg0, %c0_i32 : i32, i32
  }
  func.func @transform_2(%arg0: i32) -> (i32, i32) {
    %c0_i32 = arith.constant 0 : i32
    %c0_i32_0 = arith.constant 0 : i32
    %c0_i32_1 = arith.constant 0 : i32
    return %c0_i32, %c0_i32_0 : i32, i32
  }
  func.func @transform_3(%arg0: i32) -> (i32, i32) {
    %c0_i32 = arith.constant 0 : i32
    %c0_i32_0 = arith.constant 0 : i32
    %c0_i32_1 = arith.constant 0 : i32
    return %c0_i32, %c0_i32_0 : i32, i32
  }
  func.func @transform_4(%arg0: i32) -> (i32, i32) {
    %c0_i32 = arith.constant 0 : i32
    %c0_i32_0 = arith.constant 0 : i32
    %c0_i32_1 = arith.constant 0 : i32
    return %c0_i32, %c0_i32_0 : i32, i32
  }
  func.func @transform_5(%arg0: i32) -> (i32, i32) {
    %c0_i32 = arith.constant 0 : i32
    %c0_i32_0 = arith.constant 0 : i32
    return %arg0, %c0_i32 : i32, i32
  }
}

module attributes {stable_mosaic.version = 11 : i64} {
  func.func @_gru_bidir_kernel(%arg0: i32, %arg1: memref<8x2x96xf32, #tpu.memory_space<vmem>>, %arg2: memref<8x2x96xf32, #tpu.memory_space<vmem>>, %arg3: memref<32x96xf32, #tpu.memory_space<vmem>>, %arg4: memref<1x96xf32, #tpu.memory_space<vmem>>, %arg5: memref<32x96xf32, #tpu.memory_space<vmem>>, %arg6: memref<1x96xf32, #tpu.memory_space<vmem>>, %arg7: memref<8x2x32xf32, #tpu.memory_space<vmem>>, %arg8: memref<8x2x32xf32, #tpu.memory_space<vmem>>, %arg9: memref<2x32xf32, #tpu.memory_space<vmem>>, %arg10: memref<2x32xf32, #tpu.memory_space<vmem>>) attributes {dimension_semantics = [#tpu.dimension_semantics<arbitrary>], iteration_bounds = array<i64: 1>, scalar_prefetch = 0 : i64, scratch_operands = 2 : i64, tpu.core_type = #tpu.core_type<tc>, window_params = [{transform_indices = @transform_0, window_bounds = array<i64: 8, 2, 96>}, {transform_indices = @transform_1, window_bounds = array<i64: 8, 2, 96>}, {pipeline_mode = #tpu.pipeline_mode<synchronous>, transform_indices = @transform_2, window_bounds = array<i64: 32, 96>}, {pipeline_mode = #tpu.pipeline_mode<synchronous>, transform_indices = @transform_3, window_bounds = array<i64: 1, 96>}, {pipeline_mode = #tpu.pipeline_mode<synchronous>, transform_indices = @transform_4, window_bounds = array<i64: 32, 96>}, {pipeline_mode = #tpu.pipeline_mode<synchronous>, transform_indices = @transform_5, window_bounds = array<i64: 1, 96>}, {transform_indices = @transform_6, window_bounds = array<i64: 8, 2, 32>}, {transform_indices = @transform_7, window_bounds = array<i64: 8, 2, 32>}]} {
    %c0_i32 = arith.constant 0 : i32
    %0 = arith.cmpi eq, %arg0, %c0_i32 : i32
    %1 = arith.extui %0 : i1 to i32
    %c0_i32_0 = arith.constant 0 : i32
    %2 = arith.cmpi ne, %1, %c0_i32_0 : i32
    scf.if %2 {
      %cst = arith.constant 0.000000e+00 : f32
      %4 = vector.broadcast %cst : f32 to vector<2x32xf32>
      %c0 = arith.constant 0 : index
      %c0_3 = arith.constant 0 : index
      %5 = vector.load %arg9[%c0, %c0_3] : memref<2x32xf32, #tpu.memory_space<vmem>>, vector<2x32xf32>
      tpu.vector_store %arg9[%c0, %c0_3], %4 {strides = array<i32>} : memref<2x32xf32, #tpu.memory_space<vmem>>, vector<2x32xf32>,
      %cst_4 = arith.constant 0.000000e+00 : f32
      %6 = vector.broadcast %cst_4 : f32 to vector<2x32xf32>
      %c0_5 = arith.constant 0 : index
      %c0_6 = arith.constant 0 : index
      %7 = vector.load %arg10[%c0_5, %c0_6] : memref<2x32xf32, #tpu.memory_space<vmem>>, vector<2x32xf32>
      tpu.vector_store %arg10[%c0_5, %c0_6], %6 {strides = array<i32>} : memref<2x32xf32, #tpu.memory_space<vmem>>, vector<2x32xf32>,
    } else {
    }
    %c0_i32_1 = arith.constant 0 : i32
    %c8_i32 = arith.constant 8 : i32
    %3 = arith.addi %c0_i32_1, %c8_i32 : i32
    %c1_i32 = arith.constant 1 : i32
    scf.for %arg11 = %c0_i32_1 to %3 step %c1_i32  : i32 {
      %c1_i32_3 = arith.constant 1 : i32
      %4 = arith.muli %arg11, %c1_i32_3 : i32
      %c0_i32_4 = arith.constant 0 : i32
      %5 = arith.addi %c0_i32_4, %4 : i32
      %6 = arith.index_cast %5 : i32 to index
      %c0 = arith.constant 0 : index
      %c0_5 = arith.constant 0 : index
      %7 = vector.load %arg1[%6, %c0, %c0_5] : memref<8x2x96xf32, #tpu.memory_space<vmem>>, vector<1x2x96xf32>
      %8 = vector.shape_cast %7 : vector<1x2x96xf32> to vector<2x96xf32>
      %c0_6 = arith.constant 0 : index
      %c0_7 = arith.constant 0 : index
      %9 = vector.load %arg9[%c0_6, %c0_7] : memref<2x32xf32, #tpu.memory_space<vmem>>, vector<2x32xf32>
      %c0_8 = arith.constant 0 : index
      %c0_9 = arith.constant 0 : index
      %10 = vector.load %arg3[%c0_8, %c0_9] : memref<32x96xf32, #tpu.memory_space<vmem>>, vector<32x96xf32>
      %cst = arith.constant dense<0.000000e+00> : vector<2x96xf32>
      %11 = tpu.matmul %9, %10, %cst {dimension_numbers = #tpu.dot_dimension_numbers<[1], [0], [0], [1], [0, 0, 1, 1], [], []>} : vector<2x32xf32>, vector<32x96xf32>, vector<2x96xf32> -> vector<2x96xf32>
      %c0_10 = arith.constant 0 : index
      %c0_11 = arith.constant 0 : index
      %12 = vector.load %arg4[%c0_10, %c0_11] : memref<1x96xf32, #tpu.memory_space<vmem>>, vector<1x96xf32>
      %13 = vector.broadcast %12 : vector<1x96xf32> to vector<2x96xf32>
      %14 = arith.addf %11, %13 : vector<2x96xf32>
      %15 = vector.extract_strided_slice %8 {offsets = [0, 0], sizes = [2, 32], strides = [1, 1]} : vector<2x96xf32> to vector<2x32xf32>
      %16 = vector.extract_strided_slice %14 {offsets = [0, 0], sizes = [2, 32], strides = [1, 1]} : vector<2x96xf32> to vector<2x32xf32>
      %17 = arith.addf %15, %16 : vector<2x32xf32>
      %18 = arith.negf %17 : vector<2x32xf32>
      %19 = math.exp %18 : vector<2x32xf32>
      %cst_12 = arith.constant 1.000000e+00 : f32
      %20 = vector.broadcast %cst_12 : f32 to vector<2x32xf32>
      %21 = arith.addf %20, %19 : vector<2x32xf32>
      %22 = arith.divf %20, %21 : vector<2x32xf32>
      %23 = vector.extract_strided_slice %8 {offsets = [0, 32], sizes = [2, 32], strides = [1, 1]} : vector<2x96xf32> to vector<2x32xf32>
      %24 = vector.extract_strided_slice %14 {offsets = [0, 32], sizes = [2, 32], strides = [1, 1]} : vector<2x96xf32> to vector<2x32xf32>
      %25 = arith.addf %23, %24 : vector<2x32xf32>
      %26 = arith.negf %25 : vector<2x32xf32>
      %27 = math.exp %26 : vector<2x32xf32>
      %cst_13 = arith.constant 1.000000e+00 : f32
      %28 = vector.broadcast %cst_13 : f32 to vector<2x32xf32>
      %29 = arith.addf %28, %27 : vector<2x32xf32>
      %30 = arith.divf %28, %29 : vector<2x32xf32>
      %31 = vector.extract_strided_slice %8 {offsets = [0, 64], sizes = [2, 32], strides = [1, 1]} : vector<2x96xf32> to vector<2x32xf32>
      %32 = vector.extract_strided_slice %14 {offsets = [0, 64], sizes = [2, 32], strides = [1, 1]} : vector<2x96xf32> to vector<2x32xf32>
      %33 = arith.mulf %22, %32 : vector<2x32xf32>
      %34 = arith.addf %31, %33 : vector<2x32xf32>
      %35 = math.tanh %34 : vector<2x32xf32>
      %cst_14 = arith.constant 1.000000e+00 : f32
      %36 = vector.broadcast %cst_14 : f32 to vector<2x32xf32>
      %37 = arith.subf %36, %30 : vector<2x32xf32>
      %38 = arith.mulf %37, %35 : vector<2x32xf32>
      %39 = arith.mulf %30, %9 : vector<2x32xf32>
      %40 = arith.addf %38, %39 : vector<2x32xf32>
      %c0_15 = arith.constant 0 : index
      %c0_16 = arith.constant 0 : index
      %41 = vector.load %arg9[%c0_15, %c0_16] : memref<2x32xf32, #tpu.memory_space<vmem>>, vector<2x32xf32>
      tpu.vector_store %arg9[%c0_15, %c0_16], %40 {strides = array<i32>} : memref<2x32xf32, #tpu.memory_space<vmem>>, vector<2x32xf32>,
      %42 = arith.index_cast %5 : i32 to index
      %c0_17 = arith.constant 0 : index
      %c0_18 = arith.constant 0 : index
      %43 = vector.load %arg7[%42, %c0_17, %c0_18] : memref<8x2x32xf32, #tpu.memory_space<vmem>>, vector<1x2x32xf32>
      %44 = vector.shape_cast %43 : vector<1x2x32xf32> to vector<2x32xf32>
      %45 = vector.shape_cast %40 : vector<2x32xf32> to vector<1x2x32xf32>
      tpu.vector_store %arg7[%42, %c0_17, %c0_18], %45 {strides = array<i32>} : memref<8x2x32xf32, #tpu.memory_space<vmem>>, vector<1x2x32xf32>,
      %c7_i32 = arith.constant 7 : i32
      %46 = arith.subi %c7_i32, %5 : i32
      %47 = arith.index_cast %46 : i32 to index
      %c0_19 = arith.constant 0 : index
      %c0_20 = arith.constant 0 : index
      %48 = vector.load %arg2[%47, %c0_19, %c0_20] : memref<8x2x96xf32, #tpu.memory_space<vmem>>, vector<1x2x96xf32>
      %49 = vector.shape_cast %48 : vector<1x2x96xf32> to vector<2x96xf32>
      %c0_21 = arith.constant 0 : index
      %c0_22 = arith.constant 0 : index
      %50 = vector.load %arg10[%c0_21, %c0_22] : memref<2x32xf32, #tpu.memory_space<vmem>>, vector<2x32xf32>
      %c0_23 = arith.constant 0 : index
      %c0_24 = arith.constant 0 : index
      %51 = vector.load %arg5[%c0_23, %c0_24] : memref<32x96xf32, #tpu.memory_space<vmem>>, vector<32x96xf32>
      %cst_25 = arith.constant dense<0.000000e+00> : vector<2x96xf32>
      %52 = tpu.matmul %50, %51, %cst_25 {dimension_numbers = #tpu.dot_dimension_numbers<[1], [0], [0], [1], [0, 0, 1, 1], [], []>} : vector<2x32xf32>, vector<32x96xf32>, vector<2x96xf32> -> vector<2x96xf32>
      %c0_26 = arith.constant 0 : index
      %c0_27 = arith.constant 0 : index
      %53 = vector.load %arg6[%c0_26, %c0_27] : memref<1x96xf32, #tpu.memory_space<vmem>>, vector<1x96xf32>
      %54 = vector.broadcast %53 : vector<1x96xf32> to vector<2x96xf32>
      %55 = arith.addf %52, %54 : vector<2x96xf32>
      %56 = vector.extract_strided_slice %49 {offsets = [0, 0], sizes = [2, 32], strides = [1, 1]} : vector<2x96xf32> to vector<2x32xf32>
      %57 = vector.extract_strided_slice %55 {offsets = [0, 0], sizes = [2, 32], strides = [1, 1]} : vector<2x96xf32> to vector<2x32xf32>
      %58 = arith.addf %56, %57 : vector<2x32xf32>
      %59 = arith.negf %58 : vector<2x32xf32>
      %60 = math.exp %59 : vector<2x32xf32>
      %cst_28 = arith.constant 1.000000e+00 : f32
      %61 = vector.broadcast %cst_28 : f32 to vector<2x32xf32>
      %62 = arith.addf %61, %60 : vector<2x32xf32>
      %63 = arith.divf %61, %62 : vector<2x32xf32>
      %64 = vector.extract_strided_slice %49 {offsets = [0, 32], sizes = [2, 32], strides = [1, 1]} : vector<2x96xf32> to vector<2x32xf32>
      %65 = vector.extract_strided_slice %55 {offsets = [0, 32], sizes = [2, 32], strides = [1, 1]} : vector<2x96xf32> to vector<2x32xf32>
      %66 = arith.addf %64, %65 : vector<2x32xf32>
      %67 = arith.negf %66 : vector<2x32xf32>
      %68 = math.exp %67 : vector<2x32xf32>
      %cst_29 = arith.constant 1.000000e+00 : f32
      %69 = vector.broadcast %cst_29 : f32 to vector<2x32xf32>
      %70 = arith.addf %69, %68 : vector<2x32xf32>
      %71 = arith.divf %69, %70 : vector<2x32xf32>
      %72 = vector.extract_strided_slice %49 {offsets = [0, 64], sizes = [2, 32], strides = [1, 1]} : vector<2x96xf32> to vector<2x32xf32>
      %73 = vector.extract_strided_slice %55 {offsets = [0, 64], sizes = [2, 32], strides = [1, 1]} : vector<2x96xf32> to vector<2x32xf32>
      %74 = arith.mulf %63, %73 : vector<2x32xf32>
      %75 = arith.addf %72, %74 : vector<2x32xf32>
      %76 = math.tanh %75 : vector<2x32xf32>
      %cst_30 = arith.constant 1.000000e+00 : f32
      %77 = vector.broadcast %cst_30 : f32 to vector<2x32xf32>
      %78 = arith.subf %77, %71 : vector<2x32xf32>
      %79 = arith.mulf %78, %76 : vector<2x32xf32>
      %80 = arith.mulf %71, %50 : vector<2x32xf32>
      %81 = arith.addf %79, %80 : vector<2x32xf32>
      %c0_31 = arith.constant 0 : index
      %c0_32 = arith.constant 0 : index
      %82 = vector.load %arg10[%c0_31, %c0_32] : memref<2x32xf32, #tpu.memory_space<vmem>>, vector<2x32xf32>
      tpu.vector_store %arg10[%c0_31, %c0_32], %81 {strides = array<i32>} : memref<2x32xf32, #tpu.memory_space<vmem>>, vector<2x32xf32>,
      %83 = arith.index_cast %46 : i32 to index
      %c0_33 = arith.constant 0 : index
      %c0_34 = arith.constant 0 : index
      %84 = vector.load %arg8[%83, %c0_33, %c0_34] : memref<8x2x32xf32, #tpu.memory_space<vmem>>, vector<1x2x32xf32>
      %85 = vector.shape_cast %84 : vector<1x2x32xf32> to vector<2x32xf32>
      %86 = vector.shape_cast %81 : vector<2x32xf32> to vector<1x2x32xf32>
      tpu.vector_store %arg8[%83, %c0_33, %c0_34], %86 {strides = array<i32>} : memref<8x2x32xf32, #tpu.memory_space<vmem>>, vector<1x2x32xf32>,
    }
    %c8_i32_2 = arith.constant 8 : i32
    return
  }
  func.func @transform_0(%arg0: i32) -> (i32, i32, i32) {
    %c0_i32 = arith.constant 0 : i32
    %c0_i32_0 = arith.constant 0 : i32
    %c0_i32_1 = arith.constant 0 : i32
    return %arg0, %c0_i32, %c0_i32_0 : i32, i32, i32
  }
  func.func @transform_1(%arg0: i32) -> (i32, i32, i32) {
    %c0_i32 = arith.constant 0 : i32
    %0 = arith.subi %c0_i32, %arg0 : i32
    %c0_i32_0 = arith.constant 0 : i32
    %c0_i32_1 = arith.constant 0 : i32
    %c0_i32_2 = arith.constant 0 : i32
    return %0, %c0_i32_0, %c0_i32_1 : i32, i32, i32
  }
  func.func @transform_2(%arg0: i32) -> (i32, i32) {
    %c0_i32 = arith.constant 0 : i32
    %c0_i32_0 = arith.constant 0 : i32
    %c0_i32_1 = arith.constant 0 : i32
    return %c0_i32, %c0_i32_0 : i32, i32
  }
  func.func @transform_3(%arg0: i32) -> (i32, i32) {
    %c0_i32 = arith.constant 0 : i32
    %c0_i32_0 = arith.constant 0 : i32
    %c0_i32_1 = arith.constant 0 : i32
    return %c0_i32, %c0_i32_0 : i32, i32
  }
  func.func @transform_4(%arg0: i32) -> (i32, i32) {
    %c0_i32 = arith.constant 0 : i32
    %c0_i32_0 = arith.constant 0 : i32
    %c0_i32_1 = arith.constant 0 : i32
    return %c0_i32, %c0_i32_0 : i32, i32
  }
  func.func @transform_5(%arg0: i32) -> (i32, i32) {
    %c0_i32 = arith.constant 0 : i32
    %c0_i32_0 = arith.constant 0 : i32
    %c0_i32_1 = arith.constant 0 : i32
    return %c0_i32, %c0_i32_0 : i32, i32
  }
  func.func @transform_6(%arg0: i32) -> (i32, i32, i32) {
    %c0_i32 = arith.constant 0 : i32
    %c0_i32_0 = arith.constant 0 : i32
    %c0_i32_1 = arith.constant 0 : i32
    return %arg0, %c0_i32, %c0_i32_0 : i32, i32, i32
  }
  func.func @transform_7(%arg0: i32) -> (i32, i32, i32) {
    %c0_i32 = arith.constant 0 : i32
    %0 = arith.subi %c0_i32, %arg0 : i32
    %c0_i32_0 = arith.constant 0 : i32
    %c0_i32_1 = arith.constant 0 : i32
    %c0_i32_2 = arith.constant 0 : i32
    return %0, %c0_i32_0, %c0_i32_1 : i32, i32, i32
  }
}

</mosaic_0001>

<bundles_post_ra>
// kernel: gru_head_forward.5
= control target key start
LH: loop header
LB: loop body
LE: loop exit
PB: predicated region body
PF: predicated region fallthrough
CT: control target
= control target key end

     0   :  { %vm36_vm0 = vcmask 261120   ;;  %s350_s3 = inlined_call_operand.vmem [shape: f32[32,128], index: 3, kind: input, shape index: {}]   ;;  %s351_s2 = inlined_call_operand.vmem [shape: f32[32,128], index: 2, kind: input, shape index: {}]   ;;  %s352_s1 = inlined_call_operand.vmem [shape: f32[16,32], index: 1, kind: input, shape index: {}]   ;;  %s353_s0 = inlined_call_operand.vmem [shape: f32[16,32], index: 0, kind: input, shape index: {}]   ;;  %s354_s4 = inlined_call_operand.vmem [shape: f32[1,128], index: 4, kind: input, shape index: {}]   ;;  %s355_s5 = inlined_call_operand.vmem [shape: f32[16,128], index: 5, kind: output, shape index: {}]  }
   0x1   :  { %v32_v0 = vld [vmem:[%s350_s3] sm:$0xff]  ;;  %v33_v1 = vld [vmem:[%s350_s3 + $0x8] sm:$0xff]  ;;  %v34_v5 = vld [vmem:[%s350_s3 + $0x10] sm:$0xff] }
   0x2   :  { %v28_v2 = vld [vmem:[%s351_s2] sm:$0xff]  ;;  %v253_v3 = vpack.c.bf16 %v33_v1, %v32_v0  ;;  %v29_v4 = vld [vmem:[%s351_s2 + $0x8] sm:$0xff]  ;;  %v35_v6 = vld [vmem:[%s350_s3 + $0x18] sm:$0xff] }
   0x3   :  { %v261_v7 = vpack.c.bf16 %v29_v4, %v28_v2  ;;  %v257_v8 = vpack.c.bf16 %v35_v6, %v34_v5  ;;  %v30_v9 = vld [vmem:[%s351_s2 + $0x10] sm:$0xff]  ;;  %v31_v10 = vld [vmem:[%s351_s2 + $0x18] sm:$0xff]  ;;  %v24_v11 = vld [vmem:[%s352_s1] sm:$0xff] }
   0x4   :  { %254 = vmatprep.subr.bf16.mxu1 %v253_v3  ;;  %v265_v12 = vpack.c.bf16 %v31_v10, %v30_v9  ;;  %v26_v13 = vmax.f32 %v24_v11, 0.0  ;;  %v20_v14 = vld [vmem:[%s353_s0] sm:$0xff]  ;;  %v25_v15 = vld [vmem:[%s352_s1 + $0x8] sm:$0xff] }
   0x5   :  { %262 = vmatprep.subr.bf16.mxu0 %v261_v7  ;;  %256 = vmatpush3.bf16.msra.mxu1 %v253_v3  ;;  %v22_v16 = vmax.f32 %v20_v14, 0.0  ;;  %v21_v17 = vld [vmem:[%s353_s0 + $0x8] sm:$0xff]  ;;  %v27_v18 = vmax.f32 %v25_v15, 0.0  ;;  %v218_v22 = vld [vmem:[%s354_s4] ss:$0 sm:$0xff] }
   0x6   :  { %264 = vmatpush3.bf16.msra.mxu0 %v261_v7  ;;  %258 = vmatprep.subr.bf16.mxu1 %v257_v8  ;;  %v23_v19 = vmax.f32 %v21_v17, 0.0 }
   0x7   :  { %266 = vmatprep.subr.bf16.mxu0 %v265_v12  ;;  %239 = vmatprep.mubr.msk.f32.mxu1 %vm36_vm0, %v26_v13 }
   0x8   :  { %250 = vmatprep.mubr.msk.f32.mxu0 %vm36_vm0, %v22_v16 }
   0x9   :  { %260 = vmatpush3.bf16.msra.mxu1 %v257_v8 }
   0xa   :  { %268 = vmatpush3.bf16.msra.mxu0 %v265_v12 }
   0xc   :  { %240 = vmatmul.mubr.msk.f32.vlgmr.msra.gmra.mrb[0].mxu1 %vm36_vm0, %v27_v18 }
   0xd   :  { %251 = vmatmul.mubr.msk.f32.vlgmr.msra.gmra.mrb[0].mxu0 %vm36_vm0, %v23_v19 }
  0xdf   :  { %v241_v20 = vpop.f32.mrb[0].mxu1 }
  0xe0   :  { %v252_v21 = vpop.f32.mrb[0].mxu0  ;;  %v109_v23 = vpop.f32.mrb[1].mxu1 }
  0xe1   :  { %v196_v24 = vadd.f32 %v252_v21, %v241_v20  ;;  %v190_v25 = vpop.f32.mrb[1].mxu0 }
  0xe2   :  { %v191_v26 = vadd.f32 %v190_v25, %v109_v23 }
  0xe3   :  { %v207_v27 = vadd.f32 %v218_v22, %v196_v24 }
  0xe4   :  { %v206_v28 = vadd.f32 %v218_v22, %v191_v26 }
  0xe5   :  { %209 = vst [vmem:[%s355_s5 + $0x8] sm:$0xff] %v207_v27 }
  0xe6   :  { %208 = vst [vmem:[%s355_s5] sm:$0xff] %v206_v28 }

// kernel: gru_head_forward.3
= control target key start
LH: loop header
LB: loop body
LE: loop exit
PB: predicated region body
PF: predicated region fallthrough
CT: control target
= control target key end

     0   :  { %vm33_vm0 = vcmask 130048   ;;  %vm115_vm1 = vcmask 785408   ;;  %s323_s1 = inlined_call_operand.vmem [shape: f32[16,96], index: 1, kind: input, shape index: {}]   ;;  %s324_s2 = inlined_call_operand.vmem [shape: f32[16,96], index: 2, kind: input, shape index: {}]   ;;  %s325_s0 = inlined_call_operand.vmem [shape: f32[16,16], index: 0, kind: input, shape index: {}]   ;;  %s326_s3 = inlined_call_operand.vmem [shape: f32[1,96], index: 3, kind: input, shape index: {}]   ;;  %s327_s4 = inlined_call_operand.vmem [shape: f32[1,96], index: 4, kind: input, shape index: {}]   ;;  %s328_s5 = inlined_call_operand.vmem [shape: f32[16,96], index: 5, kind: output, shape index: {0}]   ;;  %s329_s6 = inlined_call_operand.vmem [shape: f32[16,96], index: 6, kind: output, shape index: {1}]  }
   0x1   :  { %v24_v0 = vld [vmem:[%s323_s1] sm:$0xff]  ;;  %v25_v1 = vld [vmem:[%s323_s1 + $0x8] sm:$0xff] }
   0x2   :  { %v118_v2 = vld [vmem:[%s324_s2] sm:$0xff]  ;;  %v240_v3 = vpack.c.bf16 %v25_v1, %v24_v0  ;;  %v119_v4 = vld [vmem:[%s324_s2 + $0x8] sm:$0xff] }
   0x3   :  { %v22_v5 = vld [vmem:[%s325_s0] sm:$0xff]  ;;  %v244_v6 = vpack.c.bf16 %v119_v4, %v118_v2  ;;  %v23_v7 = vld [vmem:[%s325_s0 + $0x8] sm:$0xff] }
   0x4   :  { %230 = vmatprep.mubr.msk.f32.mxu0 %vm33_vm0, %v22_v5  ;;  %237 = vmatprep.mubr.msk.f32.mxu1 %vm33_vm0, %v22_v5  ;;  %v212_v8 = vld [vmem:[%s326_s3] ss:$0 sm:$0xff] }
   0x5   :  { %241 = vmatprep.subr.bf16.mxu0 %v240_v3  ;;  %245 = vmatprep.subr.bf16.mxu1 %v244_v6  ;;  %v215_v9 = vld [vmem:[%s327_s4] ss:$0 sm:$0xff] }
   0x6   :  { %243 = vmatpush3.bf16.msra.mxu0 %v240_v3  ;;  %247 = vmatpush3.bf16.msra.mxu1 %v244_v6 }
   0x9   :  { %231 = vmatmul.mubr.msk.f32.vlgmr.msra.gmra.mrb[0].mxu0 %vm33_vm0, %v23_v7  ;;  %238 = vmatmul.mubr.msk.f32.vlgmr.msra.gmra.mrb[0].mxu1 %vm33_vm0, %v23_v7 }
  0xdc   :  { %v232_v10 = vpop.f32.mrb[0].mxu0  ;;  %v239_v12 = vpop.f32.mrb[0].mxu1 }
  0xdd   :  { %v112_v11 = vadd.f32 %v232_v10, %v212_v8  ;;  %v106_v13 = vpop.f32.mrb[1].mxu0  ;;  %v199_v14 = vadd.f32 %v239_v12, %v215_v9  ;;  %v193_v16 = vpop.f32.mrb[1].mxu1 }
  0xde   :  { %v107_v15 = vadd.f32 %v212_v8, %v106_v13  ;;  %v194_v17 = vadd.f32 %v215_v9, %v193_v16 }
  0xdf   :  { %117 = vst.msk [vmem:[%s328_s5 + $0x8] sm:$0xff] %vm115_vm1, %v112_v11  ;;  %203 = vst.msk [vmem:[%s329_s6 + $0x8] sm:$0xff] %vm115_vm1, %v199_v14 }
  0xe0   :  { %116 = vst.msk [vmem:[%s328_s5] sm:$0xff] %vm115_vm1, %v107_v15  ;;  %202 = vst.msk [vmem:[%s329_s6] sm:$0xff] %vm115_vm1, %v194_v17 }

// kernel: gru_head_forward.4
= control target key start
LH: loop header
LB: loop body
LE: loop exit
PB: predicated region body
PF: predicated region fallthrough
CT: control target
= control target key end

     0   :  { %vm65_vm0 = vcmask 254976   ;;  %v461_v0 = vmov 0.0   ;;  %s510_s24 = smov 0   ;;  %s574_s0 = inlined_call_operand.vmem [shape: f32[8,2,96], index: 0, kind: input, shape index: {}]   ;;  %s575_s1 = inlined_call_operand.vmem [shape: f32[8,2,96], index: 1, kind: input, shape index: {}]   ;;  %s576_s2 = inlined_call_operand.vmem [shape: f32[32,96], index: 2, kind: input, shape index: {}]   ;;  %s577_s3 = inlined_call_operand.vmem [shape: f32[1,96], index: 3, kind: input, shape index: {}]   ;;  %s578_s4 = inlined_call_operand.vmem [shape: f32[32,96], index: 4, kind: input, shape index: {}]   ;;  %s579_s5 = inlined_call_operand.vmem [shape: f32[1,96], index: 5, kind: input, shape index: {}]   ;;  %s580_s6 = inlined_call_operand.vmem [shape: f32[8,2,32], index: 6, kind: output, shape index: {0}]   ;;  %s581_s7 = inlined_call_operand.vmem [shape: f32[8,2,32], index: 7, kind: output, shape index: {1}]  }
   0x1   :  { %66 = vst.msk [vmem:[#allocation2] sm:$0x3] %vm65_vm0, %v461_v0  ;;  %67 = vst.msk [vmem:[#allocation3] sm:$0x3] %vm65_vm0, %v461_v0 }
   0x2 LB: > { %v78_v1 = vld [vmem:[%s576_s2] sm:$0xff]  ;;  %v79_v2 = vld [vmem:[%s576_s2 + $0x8] sm:$0xff]  ;;  %v462_v4 = vmov 0.0|0.0   ;;  %v80_v7 = vld [vmem:[%s576_s2 + $0x10] sm:$0xff]  ;;  %vm463_vm1 = vmmov 0   ;;  %v464_v10 = vmov 0.0   ;;  %s459_s24 = sphi %s510_s24, %s73_s24  }
   0x3   : > { %v205_v3 = vld [vmem:[%s578_s4] sm:$0xff]  ;;  %414 = vmatprep.subr.bf16.mxu0 %v462_v4  ;;  %v415_v5 = vpack.c.bf16 %v79_v2, %v78_v1  ;;  %420 = vmatprep.subr.bf16.mxu1 %v462_v4  ;;  %v206_v6 = vld [vmem:[%s578_s4 + $0x8] sm:$0xff]  ;;  %v81_v8 = vld [vmem:[%s576_s2 + $0x18] sm:$0xff]  ;;  %vm89_vm2 = vcmask 261120   ;;  %s465_s22 = smov 64   ;;  %s374_s23 = sshll.u32 %s459_s24, 1 }
   0x4   : > { %v421_v9 = vpack.c.bf16 %v206_v6, %v205_v3  ;;  %400 = vmatprep.mubr.msk.f32.mxu0 %vm463_vm1, %v464_v10  ;;  %v207_v11 = vld [vmem:[%s578_s4 + $0x10] sm:$0xff]  ;;  %v208_v12 = vld [vmem:[%s578_s4 + $0x18] sm:$0xff]  ;;  %411 = vmatprep.mubr.msk.f32.mxu1 %vm463_vm1, %v464_v10  ;;  %v418_v13 = vpack.c.bf16 %v81_v8, %v80_v7  ;;  %v375_v17 = vld [vmem:[%s577_s3] ss:$0 sm:$0xff]  ;;  %s200_s25 = ssub.s32 7, %s459_s24  ;;  %s75_s28 = scalar_lea.vmem %s574_s0, %s374_s23 }
   0x5   : > { %416 = vmatpush3.bf16.msra.mxu0 %v415_v5  ;;  %v424_v14 = vpack.c.bf16 %v208_v12, %v207_v11  ;;  %v379_v19 = vld [vmem:[%s579_s5] ss:$0 sm:$0xff]  ;;  %s552_s29 = sshll.u32 %s200_s25, 1  ;;  %s466_s10 = smov 32  }
   0x6   : > { %417 = vmatprep.subr.bf16.mxu0 %v462_v4  ;;  %422 = vmatpush3.bf16.msra.mxu1 %v421_v9  ;;  %v76_v25 = vld [vmem:[%s75_s28] sm:$0x3]  ;;  %s202_s9 = scalar_lea.vmem %s575_s1, %s552_s29  ;;  %s467_s11 = smov 96  }
   0x7   : > { %423 = vmatprep.subr.bf16.mxu1 %v462_v4  ;;  %v203_v27 = vld [vmem:[%s202_s9] sm:$0x3]  ;;  %s198_s14 = scalar_lea.vmem %s580_s6, %s374_s23  ;;  %s323_s17 = scalar_lea.vmem %s581_s7, %s552_s29 }
   0x8   : > { %v77_v15 = vld [vmem:[#allocation2] sm:$0x3]  ;;  %v204_v16 = vld [vmem:[#allocation3] sm:$0x3]  ;;  %s73_s24 = sadd.s32 1, %s459_s24  }
   0x9   : > { %419 = vmatpush3.bf16.msra.mxu0 %v418_v13  ;;  %p70_p0 = scmp.ge.s32.totalorder %s73_s24, 8  }
   0xa   : > { %425 = vmatpush3.bf16.msra.mxu1 %v424_v14 }
   0xc   : > { %401 = vmatmul.mubr.msk.f32.vlgmr.msra.gmra.mrb[0].mxu0 %vm89_vm2, %v77_v15 }
   0xd   : > { %412 = vmatmul.mubr.msk.f32.vlgmr.msra.gmra.mrb[0].mxu1 %vm89_vm2, %v204_v16 }
  0xdf   : > { %v159_v18 = vpop.f32.mrb[0].mxu0 }
  0xe0   : > { %v160_v20 = vadd.f32 %v375_v17, %v159_v18  ;;  %v402_v21 = vpop.f32.mrb[1].mxu0  ;;  %v285_v22 = vpop.f32.mrb[0].mxu1 }
  0xe1   : > { %v413_v23 = vpop.f32.mrb[1].mxu1  ;;  %v286_v24 = vadd.f32 %v379_v19, %v285_v22 }
  0xe2   : > { %171 = vrot.lane.b32.xlu0 %v160_v20, %s465_s22  ;;  %v163_v26 = vadd.f32 %v160_v20, %v76_v25 }
  0xe3   : > { %v289_v29 = vadd.f32 %v286_v24, %v203_v27 }
  0xe4   : > { %v377_v28 = vmul.f32 -1.442695, %v163_v26 }
  0xe5   : > { %v381_v30 = vmul.f32 -1.442695, %v289_v29 }
  0xe6   : > { %297 = vrot.lane.b32.xlu0 %v286_v24, %s465_s22  ;;  %441 = vpow2.f32 %v377_v28 }
  0xe7   : > { %443 = vpow2.f32 %v381_v30 }
  0xf0   : > { %v442_v31 = vpop.eup %441 }
  0xf1   : > { %v167_v32 = vadd.f32 1.0, %v442_v31  ;;  %v444_v33 = vpop.eup %443 }
  0xf2   : > { %v293_v34 = vadd.f32 1.0, %v444_v33 }
  0xf3   : > { %445 = vrcp.f32 %v167_v32 }
  0xf4   : > { %447 = vrcp.f32 %v293_v34 }
  0xfd   : > { %v446_v35 = vpop.eup %445 }
  0xfe   : > { %v448_v38 = vpop.eup %447  ;;  %v181_v48 = vsub.f32 1.0, %v446_v35 }
  0xff   : > { %v307_v54 = vsub.f32 1.0, %v448_v38 }
 0x154   : > { %v172_v36 = vpop.permute.xlu0 %171 }
 0x155   : > { %v174_v37 = vmul.f32 %v446_v35, %v172_v36 }
 0x157   : > { %176 = vrot.lane.b32.xlu1 %v174_v37, %s465_s22 }
 0x158   : > { %v298_v39 = vpop.permute.xlu0 %297 }
 0x159   : > { %v300_v40 = vmul.f32 %v448_v38, %v298_v39 }
 0x15b   : > { %302 = vrot.lane.b32.xlu1 %v300_v40, %s465_s22 }
 0x15f   : > { %187 = vrot.lane.b32.xlu1 %v77_v15, %s466_s10 }
 0x163   : > { %313 = vrot.lane.b32.xlu1 %v204_v16, %s466_s10 }
 0x1c9   : > { %v177_v41 = vpop.permute.xlu1 %176 }
 0x1ca   : > { %v179_v42 = vadd.f32 %v177_v41, %v76_v25 }
 0x1cc   : > { %449 = vtanh.f32 %v179_v42 }
 0x1cd   : > { %v303_v43 = vpop.permute.xlu1 %302 }
 0x1ce   : > { %v305_v44 = vadd.f32 %v303_v43, %v203_v27 }
 0x1d0   : > { %451 = vtanh.f32 %v305_v44 }
 0x1d1   : > { %v188_v47 = vpop.permute.xlu1 %187 }
 0x1d2   : > { %v190_v50 = vmul.f32 %v446_v35, %v188_v47 }
 0x1d5   : > { %v314_v52 = vpop.permute.xlu1 %313 }
 0x1d6   : > { %v450_v45 = vpop.eup %449  ;;  %v316_v56 = vmul.f32 %v448_v38, %v314_v52 }
 0x1d7   : > { %183 = vrot.lane.b32.xlu0 %v450_v45, %s467_s11 }
 0x1da   : > { %v452_v46 = vpop.eup %451 }
 0x1db   : > { %309 = vrot.lane.b32.xlu0 %v452_v46, %s467_s11 }
 0x249   : > { %v184_v49 = vpop.permute.xlu0 %183 }
 0x24a   : > { %v186_v51 = vmul.f32 %v184_v49, %v181_v48 }
 0x24c   : > { %v191_v53 = vadd.f32 %v190_v50, %v186_v51 }
 0x24d   : > { %v310_v55 = vpop.permute.xlu0 %309 }
 0x24e   : > { %v312_v57 = vmul.f32 %v310_v55, %v307_v54  ;;  %193 = vrot.lane.b32.xlu0 %v191_v53, %s467_s11 }
 0x250   : > { %v317_v58 = vadd.f32 %v316_v56, %v312_v57 }
 0x252   : > { %319 = vrot.lane.b32.xlu1 %v317_v58, %s467_s11 }
 0x2bf   :  { %72 = sbr.rel (!%p70_p0) target bundleno = 2 (0x2), region = 74 }
 0x2c0   : > { %v194_v59 = vpop.permute.xlu0 %193 }
 0x2c1   : > { %197 = vst.msk [vmem:[#allocation2] sm:$0x3] %vm65_vm0, %v194_v59  ;;  %199 = vst.msk [vmem:[%s198_s14] sm:$0x3] %vm65_vm0, %v194_v59 }
 0x2c4   : > { %v320_v60 = vpop.permute.xlu1 %319 }
 0x2c5   : > { %322 = vst.msk [vmem:[#allocation3] sm:$0x3] %vm65_vm0, %v320_v60  ;;  %324 = vst.msk [vmem:[%s323_s17] sm:$0x3] %vm65_vm0, %v320_v60 }

</bundles_post_ra>
